<compile_context>
chip_gen: v5e
topology: v5e:2x2
jax: 0.10.0
libtpu: 0.0.40
codegen_flags: <defaults>
</compile_context>

<pallas_src>
import jax
import jax.numpy as jnp
from jax.experimental import pallas as pl
from jax.experimental.pallas import tpu as pltpu

D_IN, H1, H2, D_OUT = 128, 64, 32, 2
HP = 128  # lane-dense padded hidden width


def _round_up(x, m):
    return (x + m - 1) // m * m


def mlp_kernel(x_ref, w1_ref, w2_ref, w3_ref, b_ref, o_ref):
    # x arrives as f32; cast to bf16 on the VPU (free in VALU slack).
    x = x_ref[...].astype(jnp.bfloat16)          # (tm, 128)
    b = b_ref[...]                               # (3, 128) f32 packed biases

    # Linear(128 -> 64, padded to 128) + ReLU.  Padded lanes stay zero
    # because both the weight columns and the bias lanes are zero.
    h1 = jnp.dot(x, w1_ref[...], preferred_element_type=jnp.float32)
    h1 = jnp.maximum(h1 + b[0:1, :], 0.0).astype(jnp.bfloat16)      # (tm, 128)

    # Linear(64 -> 32, padded to 128) + ReLU.
    h2 = jnp.dot(h1, w2_ref[...], preferred_element_type=jnp.float32)
    h2 = jnp.maximum(h2 + b[1:2, :], 0.0).astype(jnp.bfloat16)      # (tm, 128)

    # Linear(32 -> 2).  Compute a full MXU tile, then store only the 2 real
    # output columns — the HBM writeback is (tm, 2) f32, not (tm, 128).
    out = jnp.dot(h2, w3_ref[...], preferred_element_type=jnp.float32)
    o_ref[...] = (out[:, :D_OUT] + b[2:3, :D_OUT]).astype(o_ref.dtype)
    # TODO(synk): on v5e/v6e, interleave two independent row-half chains
    # (unrolled fori_loop) to hide MXU result-FIFO drain of the dependent
    # dot1->dot2->dot3 chain; second-order once HBM traffic is fixed.


def prepare_params(w1, b1, w2, b2, w3, b3):
    """One-time parameter prep: bf16 casts, lane padding, bias packing."""
    w1p = jnp.zeros((D_IN, HP), jnp.bfloat16).at[:, :H1].set(
        w1.astype(jnp.bfloat16))
    w2p = jnp.zeros((HP, HP), jnp.bfloat16).at[:H1, :H2].set(
        w2.astype(jnp.bfloat16))
    w3p = jnp.zeros((HP, HP), jnp.bfloat16).at[:H2, :D_OUT].set(
        w3.astype(jnp.bfloat16))
    bias = jnp.zeros((3, HP), jnp.float32)
    bias = bias.at[0, :H1].set(b1.reshape(-1))
    bias = bias.at[1, :H2].set(b2.reshape(-1))
    bias = bias.at[2, :D_OUT].set(b3.reshape(-1))
    return w1p, w2p, w3p, bias


def mlp_forward(x, prepared, *, block_m=2048):
    w1p, w2p, w3p, bias = prepared
    batch = x.shape[0]

    # Batch tiling: weights/biases are VMEM-resident, x / out tiles stream.
    padded16 = _round_up(max(batch, 1), 16)      # bf16 sublane packing
    tm = min(block_m, padded16)
    if padded16 // tm < 2 and padded16 >= 32:
        # Keep at least 2 (even) grid steps so v7x's two TensorCores both
        # get work under dimension_semantics=("parallel",).
        tm = _round_up(padded16 // 2, 16)
    padded_batch = _round_up(batch, tm)
    xp = x if padded_batch == batch else jnp.pad(
        x, ((0, padded_batch - batch), (0, 0)))
    grid = (padded_batch // tm,)

    flops = 2 * padded_batch * (D_IN * HP + HP * HP + HP * HP)
    bytes_accessed = (
        padded_batch * D_IN * 4                      # x (f32)
        + (D_IN * HP + HP * HP + HP * HP) * 2        # resident weights (bf16)
        + 3 * HP * 4                                 # packed biases (f32)
        + padded_batch * D_OUT * 4)                  # output (f32, 2-wide)

    const = lambda shape: pl.BlockSpec(shape, lambda i: tuple(0 for _ in shape))
    out = pl.pallas_call(
        mlp_kernel,
        out_shape=jax.ShapeDtypeStruct((padded_batch, D_OUT), jnp.float32),
        grid=grid,
        in_specs=[
            pl.BlockSpec((tm, D_IN), lambda i: (i, 0)),  # streamed x tile (f32)
            const((D_IN, HP)),                           # resident W1
            const((HP, HP)),                             # resident W2
            const((HP, HP)),                             # resident W3
            const((3, HP)),                              # resident packed biases
        ],
        out_specs=pl.BlockSpec((tm, D_OUT), lambda i: (i, 0)),
        compiler_params=pltpu.CompilerParams(
            dimension_semantics=("parallel",)),
        cost_estimate=pl.CostEstimate(
            flops=flops, transcendentals=0, bytes_accessed=bytes_accessed),
    )(xp, w1p, w2p, w3p, bias)
    return out[:batch]


def init_params(key):
    # Deterministic init mimicking torch.nn.Linear (uniform +/- 1/sqrt(fan_in)).
    dims = [(D_IN, H1), (H1, H2), (H2, D_OUT)]
    params = []
    for fan_in, fan_out in dims:
        key, kw, kb = jax.random.split(key, 3)
        bound = 1.0 / jnp.sqrt(fan_in)
        w = jax.random.uniform(kw, (fan_in, fan_out), jnp.float32, -bound, bound)
        b = jax.random.uniform(kb, (fan_out,), jnp.float32, -bound, bound)
        params += [w, b]
    return params


def reference(x, w1, b1, w2, b2, w3, b3):
    h1 = jnp.maximum(x @ w1 + b1, 0.0)
    h2 = jnp.maximum(h1 @ w2 + b2, 0.0)
    return h2 @ w3 + b3


if __name__ == "__main__":
    key = jax.random.PRNGKey(0)
    key, kx = jax.random.split(key)
    batch = 64
    x = jax.random.normal(kx, (batch, D_IN), jnp.float32)
    params = init_params(key)

    prepared = prepare_params(*params)            # one-time param prep
    out = jax.block_until_ready(mlp_forward(x, prepared))
    ref = reference(x, *params)

    assert out.shape == (batch, D_OUT)
    # bf16 MXU operands (deliberate speed/accuracy trade on layer 1) ->
    # compare against the f32 reference with a loose tolerance.
    assert jnp.allclose(out, ref, atol=3e-2, rtol=3e-2), float(
        jnp.max(jnp.abs(out - ref)))
    print("KERNEL_OK")
</pallas_src>

<mosaic_0001>
module attributes {stable_mosaic.version = 11 : i64} {
  func.func @mlp_kernel(%arg0: i32, %arg1: memref<32x128xf32, #tpu.memory_space<vmem>>, %arg2: memref<128x128xbf16, #tpu.memory_space<vmem>>, %arg3: memref<128x128xbf16, #tpu.memory_space<vmem>>, %arg4: memref<128x128xbf16, #tpu.memory_space<vmem>>, %arg5: memref<3x128xf32, #tpu.memory_space<vmem>>, %arg6: memref<32x2xf32, #tpu.memory_space<vmem>>) attributes {dimension_semantics = [#tpu.dimension_semantics<parallel>], iteration_bounds = array<i64: 2>, scalar_prefetch = 0 : i64, scratch_operands = 0 : i64, tpu.core_type = #tpu.core_type<tc>, window_params = [{transform_indices = @transform_0, window_bounds = array<i64: 32, 128>}, {pipeline_mode = #tpu.pipeline_mode<synchronous>, transform_indices = @transform_1, window_bounds = array<i64: 128, 128>}, {pipeline_mode = #tpu.pipeline_mode<synchronous>, transform_indices = @transform_2, window_bounds = array<i64: 128, 128>}, {pipeline_mode = #tpu.pipeline_mode<synchronous>, transform_indices = @transform_3, window_bounds = array<i64: 128, 128>}, {pipeline_mode = #tpu.pipeline_mode<synchronous>, transform_indices = @transform_4, window_bounds = array<i64: 3, 128>}, {transform_indices = @transform_5, window_bounds = array<i64: 32, 2>}]} {
    %c0 = arith.constant 0 : index
    %c0_0 = arith.constant 0 : index
    %0 = vector.load %arg1[%c0, %c0_0] : memref<32x128xf32, #tpu.memory_space<vmem>>, vector<32x128xf32>
    %1 = arith.truncf %0 : vector<32x128xf32> to vector<32x128xbf16>
    %c0_1 = arith.constant 0 : index
    %c0_2 = arith.constant 0 : index
    %2 = vector.load %arg5[%c0_1, %c0_2] : memref<3x128xf32, #tpu.memory_space<vmem>>, vector<3x128xf32>
    %c0_3 = arith.constant 0 : index
    %c0_4 = arith.constant 0 : index
    %3 = vector.load %arg2[%c0_3, %c0_4] : memref<128x128xbf16, #tpu.memory_space<vmem>>, vector<128x128xbf16>
    %cst = arith.constant dense<0.000000e+00> : vector<32x128xf32>
    %4 = tpu.matmul %1, %3, %cst {dimension_numbers = #tpu.dot_dimension_numbers<[1], [0], [0], [1], [0, 0, 1, 1], [], []>} : vector<32x128xbf16>, vector<128x128xbf16>, vector<32x128xf32> -> vector<32x128xf32>
    %5 = vector.extract_strided_slice %2 {offsets = [0, 0], sizes = [1, 128], strides = [1, 1]} : vector<3x128xf32> to vector<1x128xf32>
    %6 = vector.broadcast %5 : vector<1x128xf32> to vector<32x128xf32>
    %7 = arith.addf %4, %6 : vector<32x128xf32>
    %cst_5 = arith.constant 0.000000e+00 : f32
    %8 = vector.broadcast %cst_5 : f32 to vector<32x128xf32>
    %9 = arith.maximumf %7, %8 : vector<32x128xf32>
    %10 = arith.truncf %9 : vector<32x128xf32> to vector<32x128xbf16>
    %c0_6 = arith.constant 0 : index
    %c0_7 = arith.constant 0 : index
    %11 = vector.load %arg3[%c0_6, %c0_7] : memref<128x128xbf16, #tpu.memory_space<vmem>>, vector<128x128xbf16>
    %cst_8 = arith.constant dense<0.000000e+00> : vector<32x128xf32>
    %12 = tpu.matmul %10, %11, %cst_8 {dimension_numbers = #tpu.dot_dimension_numbers<[1], [0], [0], [1], [0, 0, 1, 1], [], []>} : vector<32x128xbf16>, vector<128x128xbf16>, vector<32x128xf32> -> vector<32x128xf32>
    %13 = vector.extract_strided_slice %2 {offsets = [1, 0], sizes = [1, 128], strides = [1, 1]} : vector<3x128xf32> to vector<1x128xf32>
    %14 = vector.broadcast %13 : vector<1x128xf32> to vector<32x128xf32>
    %15 = arith.addf %12, %14 : vector<32x128xf32>
    %cst_9 = arith.constant 0.000000e+00 : f32
    %16 = vector.broadcast %cst_9 : f32 to vector<32x128xf32>
    %17 = arith.maximumf %15, %16 : vector<32x128xf32>
    %18 = arith.truncf %17 : vector<32x128xf32> to vector<32x128xbf16>
    %c0_10 = arith.constant 0 : index
    %c0_11 = arith.constant 0 : index
    %19 = vector.load %arg4[%c0_10, %c0_11] : memref<128x128xbf16, #tpu.memory_space<vmem>>, vector<128x128xbf16>
    %cst_12 = arith.constant dense<0.000000e+00> : vector<32x128xf32>
    %20 = tpu.matmul %18, %19, %cst_12 {dimension_numbers = #tpu.dot_dimension_numbers<[1], [0], [0], [1], [0, 0, 1, 1], [], []>} : vector<32x128xbf16>, vector<128x128xbf16>, vector<32x128xf32> -> vector<32x128xf32>
    %21 = vector.extract_strided_slice %20 {offsets = [0, 0], sizes = [32, 2], strides = [1, 1]} : vector<32x128xf32> to vector<32x2xf32>
    %22 = vector.extract_strided_slice %2 {offsets = [2, 0], sizes = [1, 2], strides = [1, 1]} : vector<3x128xf32> to vector<1x2xf32>
    %23 = vector.broadcast %22 : vector<1x2xf32> to vector<32x2xf32>
    %24 = arith.addf %21, %23 : vector<32x2xf32>
    %c0_13 = arith.constant 0 : index
    %c0_14 = arith.constant 0 : index
    %25 = vector.load %arg6[%c0_13, %c0_14] : memref<32x2xf32, #tpu.memory_space<vmem>>, vector<32x2xf32>
    tpu.vector_store %arg6[%c0_13, %c0_14], %24 {strides = array<i32>} : memref<32x2xf32, #tpu.memory_space<vmem>>, vector<32x2xf32>,
    return
  }
  func.func @transform_0(%arg0: i32) -> (i32, i32) {
    %c0_i32 = arith.constant 0 : i32
    %c0_i32_0 = arith.constant 0 : i32
    return %arg0, %c0_i32 : i32, i32
  }
  func.func @transform_1(%arg0: i32) -> (i32, i32) {
    %c0_i32 = arith.constant 0 : i32
    %c0_i32_0 = arith.constant 0 : i32
    %c0_i32_1 = arith.constant 0 : i32
    return %c0_i32, %c0_i32_0 : i32, i32
  }
  func.func @transform_2(%arg0: i32) -> (i32, i32) {
    %c0_i32 = arith.constant 0 : i32
    %c0_i32_0 = arith.constant 0 : i32
    %c0_i32_1 = arith.constant 0 : i32
    return %c0_i32, %c0_i32_0 : i32, i32
  }
  func.func @transform_3(%arg0: i32) -> (i32, i32) {
    %c0_i32 = arith.constant 0 : i32
    %c0_i32_0 = arith.constant 0 : i32
    %c0_i32_1 = arith.constant 0 : i32
    return %c0_i32, %c0_i32_0 : i32, i32
  }
  func.func @transform_4(%arg0: i32) -> (i32, i32) {
    %c0_i32 = arith.constant 0 : i32
    %c0_i32_0 = arith.constant 0 : i32
    %c0_i32_1 = arith.constant 0 : i32
    return %c0_i32, %c0_i32_0 : i32, i32
  }
  func.func @transform_5(%arg0: i32) -> (i32, i32) {
    %c0_i32 = arith.constant 0 : i32
    %c0_i32_0 = arith.constant 0 : i32
    return %arg0, %c0_i32 : i32, i32
  }
}

</mosaic_0001>

<bundles_post_ra>
// kernel: tpu_custom_call.1
= control target key start
LH: loop header
LB: loop body
LE: loop exit
PB: predicated region body
PF: predicated region fallthrough
CT: control target
= control target key end

     0   :  { %10 = vsyncpa [#allocation3], 0  ;;  %s1301_s0 = inlined_call_operand.hbm [shape: f32[64,128], index: 0, kind: input, shape index: {}]   ;;  %s1302_s1 = inlined_call_operand.hbm [shape: bf16[128,128], index: 1, kind: input, shape index: {}]   ;;  %s1303_s2 = inlined_call_operand.hbm [shape: bf16[128,128], index: 2, kind: input, shape index: {}]   ;;  %s1304_s3 = inlined_call_operand.hbm [shape: bf16[128,128], index: 3, kind: input, shape index: {}]   ;;  %s1305_s4 = inlined_call_operand.hbm [shape: f32[3,128], index: 4, kind: input, shape index: {}]   ;;  %s1306_s5 = inlined_call_operand.vmem [shape: f32[64,2], index: 5, kind: output, shape index: {}]  }
   0x1   :  { %12 = vsyncpa [#allocation3 + $0x1], 0 }
   0x2   :  { %13 = vsyncpa [#allocation5], 0 }
   0x3   :  { %14 = vsyncpa [#allocation8], 0  ;;  %s1164_s18 = smov 0   ;;  %s1166_s19 = smov 0  }
   0x4   :  { %s1168_s20 = smov 0   ;;  %s1170_s21 = smov 0  }
   0x5 LB: > { %s698_s22 = sadd.s32 4294967295, %s1124_s21   ;;  %p40_p0 = scmp.ne.s32.totalorder %s1116_s19, %s1112_s18  ;;  %s1124_s21 = sphi %s1170_s21, %s1315_s21   ;;  %s1120_s20 = sphi %s1168_s20, %s1314_s20   ;;  %s1116_s19 = sphi %s1166_s19, %s1313_s19   ;;  %s1112_s18 = sphi %s1164_s18, %s1312_s18  }
   0x6   : > { %p1186_p1 = scmp.eq.s32.totalorder %s698_s22, 0  ;;  %p700_p2 = scmp.ge.s32.totalorder %s1124_s21, 1 }
   0x7   : > { %p161_p3 = scmp.lt.s32.totalorder %s1124_s21, 3  ;;  %s172_s27 = sshll.u32 %s1302_s1, 4  ;;  %s173_s27 = int_to_ptr.hbm [resolvable:$true] %s172_s27 }
   0x8   : > { %p1194_p4 = por %p1186_p1, %p40_p0  ;;  %s1126_s29 = smov [#allocation4]  }
   0x9   : > { %p1201_p5 = pnand %p700_p2, %p161_p3  ;;  %s174_s30 = sshll.u32 %s1126_s29, 4  ;;  %s175_s30 = int_to_ptr.vmem [resolvable:$true] %s174_s30 }
   0xa   : > { %s200_s9 = sshll.u32 %s1304_s3, 4  ;;  %s1127_s10 = smov 64   ;;  %s201_s9 = int_to_ptr.hbm [resolvable:$true] %s200_s9 }
   0xb   : > { %p866_p6 = pneg %p1201_p5  ;;  %s1128_s11 = smov 4  }
   0xc   : > { %s1129_s12 = smov [#allocation7]   ;;  %s186_s16 = sshll.u32 %s1303_s2, 4  ;;  %s187_s16 = int_to_ptr.hbm [resolvable:$true] %s186_s16 }
   0xd   : > { %p1209_p7 = pnand %p866_p6, %p1186_p1  ;;  %s202_s13 = sshll.u32 %s1129_s12, 4  ;;  %s203_s13 = int_to_ptr.vmem [resolvable:$true] %s202_s13 }
   0xe   : > { %s215_s25 = sshll.u32 %s1305_s4, 4  ;;  %s1130_s26 = smov [#allocation6]   ;;  %s216_s25 = int_to_ptr.hbm [resolvable:$true] %s215_s25 }
   0xf   : > { %869 = dma.hbm_to_vmem [thread:$0]  (!%p1209_p7), %s173_s27, 1024, %s175_s30, [#allocation5], %s1127_s10, %s1127_s10, %s1128_s11  }
  0x10   : > { %875 = dma.hbm_to_vmem [thread:$0]  (!%p1209_p7), %s201_s9, 1024, %s203_s13, [#allocation8], %s1127_s10, %s1127_s10, %s1128_s11  }
  0x11   : > { %s188_s27 = sshll.u32 %s1130_s26, 4  ;;  %s1131_s29 = smov [#allocation9]   ;;  %s189_s27 = int_to_ptr.vmem [resolvable:$true] %s188_s27 }
  0x12   : > { %872 = dma.hbm_to_vmem [thread:$0]  (!%p1209_p7), %s187_s16, 1024, %s189_s27, [#allocation5], %s1127_s10, %s1127_s10, %s1128_s11  }
  0x13   : > { %s217_s30 = sshll.u32 %s1131_s29, 4  ;;  %s1231_s7 = sadd.s32 1, %s1124_s21   ;;  %s218_s30 = int_to_ptr.vmem [resolvable:$true] %s217_s30 }
  0x14   : > { %878 = dma.hbm_to_vmem [thread:$0]  (!%p1209_p7), %s216_s25, 64, %s218_s30, [#allocation8]  }
  0x15   : > { %s27_s8 = sadd.s32 1, %s1120_s20  ;;  %s24_s9 = ssub.s32 %s1124_s21, %s1231_s7 }
  0x16   : > { %p34_p8 = scmp.ne.s32.totalorder %s1120_s20, %s1116_s19  ;;  %p25_p9 = scmp.eq.s32.totalorder %s24_s9, 0 }
  0x17   : > { %p35_p10 = scmp.eq.s32.totalorder %s1124_s21, 0  ;;  %p887_p11 = scmp.lt.s32.totalorder %s1124_s21, 2 }
  0x18   : > { %s228_s12 = sand.u32 1, %s1120_s20   ;;  %s815_s11 = sshll.u32 %s1124_s21, 5 }
  0x19   : > { %s1242_s13 = scalar_select %p25_p9, %s1120_s20, %s27_s8  }
  0x1a   : > { %p36_p12 = por %p35_p10, %p34_p8  ;;  %s706_s10 = sshll.u32 %s228_s12, 5 }
  0x1b   : > { %s237_s6 = scalar_lea.hbm %s1301_s0, %s815_s11  ;;  %s232_s17 = scalar_lea.vmem [#allocation2], %s706_s10 }
  0x1c   : > { %s238_s16 = sshll.u32 %s237_s6, 4  ;;  %s240_s18 = sshll.u32 %s232_s17, 4  ;;  %s239_s16 = int_to_ptr.hbm [resolvable:$true] %s238_s16  ;;  %s241_s18 = int_to_ptr.vmem [resolvable:$true] %s240_s18 }
  0x1d   : > { %p1248_p13 = pnand %p887_p11, %p36_p12  ;;  %s229_s26 = scalar_lea.sflag [#allocation3], %s228_s12 }
  0x1e   : > { %s1052_s27 = sshra.s32 %s239_s16, 4  ;;  %s1059_s9 = scalar_lea.hbm %s1301_s0, 64  ;;  %s1053_s27 = int_to_ptr.hbm [resolvable:$true] %s1052_s27 }
  0x1f   : > { %s1054_s29 = scalar_lea.hbm %s1053_s27, 32  ;;  %p1056_p2 = pneg %p1248_p13 }
  0x20   : > { %p1055_p0 = scmp.ne.s32.totalorder %s1053_s27, %s1054_s29  ;;  %p1060_p7 = scmp.lt.s32.totalorder %s1053_s27, %s1301_s0 }
  0x21   : > { %p1061_p8 = scmp.lt.s32.totalorder %s1059_s9, %s1054_s29 }
  0x22   : > { %p1057_p3 = pnand %p1056_p2, %p1055_p0 }
  0x23   : > { %p1062_p9 = por %p1061_p8, %p1060_p7 }
  0x24   : > { %p1058_p6 = pneg %p1057_p3 }
  0x26   : > { %p1063_p10 = pnand %p1062_p9, %p1058_p6 }
  0x28   : > { %1066 = shalt.err (!%p1063_p10)
}
  0x29   : > { %s1132_s12 = smov 128   ;;  %s1133_s14 = smov 8  }
  0x2a   : > { %882 = dma.hbm_to_vmem [thread:$0]  (!%p1248_p13), %s239_s16, 512, %s241_s18, %s229_s26, %s1132_s12, %s1132_s12, %s1133_s14  }
  0x2b   : > { %252 = sbr.rel (%p1201_p5) target bundleno = 524 (0x20c), region = 40  ;;  %s254_s15 = sand.u32 (!%p1201_p5), 1, %s1116_s19  }
  0x2c   : > { %s710_s6 = sshll.u32 (!%p1201_p5), %s254_s15, 5  ;;  %s255_s17 = scalar_lea.sflag (!%p1201_p5), [#allocation3], %s254_s15 }
  0x2d   : > { %s1265_s30 = scalar_lea.vmem (!%p1201_p5), [#allocation2], %s710_s6 }
  0x30   : > { %1099 = dma.done.wait (%p1194_p4), %s255_s17, 512  }
  0x31   : > { %1101 = vsyncadd (%p1194_p4), %s255_s17, 4294966784 }
  0x32   : > { %1103 = dma.done.wait (%p1186_p1), [#allocation5], 2048  }
  0x33   : > { %1105 = vsyncadd (%p1186_p1), [#allocation5], 4294965248 }
  0x34   : > { %1107 = dma.done.wait (%p1186_p1), [#allocation8], 1088  }
  0x35   : > { %1109 = vsyncadd (%p1186_p1), [#allocation8], 4294966208  ;;  %v823_v0 = vld [vmem:[#allocation4 + $0x38] sm:$0xff]  ;;  %v822_v1 = vld [vmem:[#allocation4 + $0x30] sm:$0xff]  ;;  %s715_s23 = sshll.u32 %s698_s22, 2  ;;  %vm588_vm0 = vcmask 15360  }
  0x36   : > { %385 = vmatpush.bf16.msra.mxu0 %v823_v0  ;;  %840 = vmatpush.bf16.msra.mxu3 %v823_v0  ;;  %v831_v2 = vld [vmem:[#allocation6 + $0x38] sm:$0xff]  ;;  %v821_v3 = vld [vmem:[#allocation4 + $0x28] sm:$0xff]  ;;  %v830_v4 = vld [vmem:[#allocation6 + $0x30] sm:$0xff]  ;;  %p308_p1 = scmp.lt.s32.totalorder %s715_s23, 7 }
  0x37   : > { %475 = vmatpush.bf16.msra.mxu1 %v831_v2  ;;  %v820_v5 = vld [vmem:[#allocation4 + $0x20] sm:$0xff]  ;;  %v829_v6 = vld [vmem:[#allocation6 + $0x28] sm:$0xff]  ;;  %v819_v7 = vld [vmem:[#allocation4 + $0x18] sm:$0xff] }
  0x38   : > { %v828_v8 = vld [vmem:[#allocation6 + $0x20] sm:$0xff]  ;;  %v818_v9 = vld [vmem:[#allocation4 + $0x10] sm:$0xff]  ;;  %v817_v10 = vld [vmem:[#allocation4 + $0x8] sm:$0xff]  ;;  %s1317_s23 = smov (!%p308_p1, %s715_s23), 7 }
  0x39   : > { %v816_v11 = vld [vmem:[#allocation4] sm:$0xff]  ;;  %v314_v13 = vld [vmem:[%s1265_s30 + $0x8] sm:$0xff]  ;;  %v315_v14 = vld [vmem:[%s1265_s30 + $0x10] sm:$0xff]  ;;  %s716_s24 = sshll.u32 %s1317_s23, 3 }
  0x3a   : > { %386 = vmatpush.bf16.msra.mxu0 %v822_v1  ;;  %841 = vmatpush.bf16.msra.mxu3 %v822_v1  ;;  %v313_v12 = vld [vmem:[%s1265_s30] sm:$0xff]  ;;  %v316_v15 = vld [vmem:[%s1265_s30 + $0x18] sm:$0xff]  ;;  %v826_v19 = vld [vmem:[#allocation6 + $0x10] sm:$0xff]  ;;  %s311_s18 = scalar_lea.vmem %s1306_s5, %s716_s24 }
  0x3b   : > { %476 = vmatpush.bf16.msra.mxu1 %v830_v4  ;;  %v317_v16 = vpack.c.bf16 %v314_v13, %v313_v12  ;;  %v318_v17 = vpack.c.bf16 %v316_v15, %v315_v14  ;;  %v827_v18 = vld [vmem:[#allocation6 + $0x18] sm:$0xff]  ;;  %v825_v20 = vld [vmem:[#allocation6 + $0x8] sm:$0xff]  ;;  %v824_v21 = vld [vmem:[#allocation6] sm:$0xff] }
  0x3c   : > { %v839_v22 = vld [vmem:[#allocation7 + $0x38] sm:$0xff]  ;;  %v319_v23 = vld [vmem:[#allocation9] sm:$0x7]  ;;  %v838_v25 = vld [vmem:[#allocation7 + $0x30] sm:$0xff] }
  0x3d   : > { %564 = vmatpush.bf16.msra.mxu2 %v839_v22  ;;  %v336_v26 = vperm.slane %v319_v23, 0  ;;  %v837_v27 = vld [vmem:[#allocation7 + $0x28] sm:$0xff]  ;;  %v836_v32 = vld [vmem:[#allocation7 + $0x20] sm:$0xff]  ;;  %v835_v42 = vld [vmem:[#allocation7 + $0x18] sm:$0xff]  ;;  %v426_v47 = vperm.slane %v319_v23, 1  ;;  %v583_v61 = vperm.slane %v319_v23, 2 }
  0x3e   : > { %387 = vmatpush.bf16.msra.mxu0 %v821_v3  ;;  %842 = vmatpush.bf16.msra.mxu3 %v821_v3  ;;  %v834_v43 = vld [vmem:[#allocation7 + $0x10] sm:$0xff]  ;;  %v833_v44 = vld [vmem:[#allocation7 + $0x8] sm:$0xff]  ;;  %v832_v45 = vld [vmem:[#allocation7] sm:$0xff] }
  0x3f   : > { %477 = vmatpush.bf16.msra.mxu1 %v829_v6 }
  0x41   : > { %565 = vmatpush.bf16.msra.mxu2 %v838_v25 }
  0x42   : > { %388 = vmatpush.bf16.msra.mxu0 %v820_v5  ;;  %843 = vmatpush.bf16.msra.mxu3 %v820_v5 }
  0x43   : > { %478 = vmatpush.bf16.msra.mxu1 %v828_v8 }
  0x45   : > { %566 = vmatpush.bf16.msra.mxu2 %v837_v27 }
  0x46   : > { %389 = vmatpush.bf16.msra.mxu0 %v819_v7  ;;  %844 = vmatpush.bf16.msra.mxu3 %v819_v7 }
  0x47   : > { %479 = vmatpush.bf16.msra.mxu1 %v827_v18 }
  0x49   : > { %567 = vmatpush.bf16.msra.mxu2 %v836_v32 }
  0x4a   : > { %390 = vmatpush.bf16.msra.mxu0 %v818_v9  ;;  %845 = vmatpush.bf16.msra.mxu3 %v818_v9 }
  0x4b   : > { %480 = vmatpush.bf16.msra.mxu1 %v826_v19 }
  0x4d   : > { %568 = vmatpush.bf16.msra.mxu2 %v835_v42 }
  0x4e   : > { %391 = vmatpush.bf16.msra.mxu0 %v817_v10  ;;  %846 = vmatpush.bf16.msra.mxu3 %v817_v10 }
  0x4f   : > { %481 = vmatpush.bf16.msra.mxu1 %v825_v20 }
  0x51   : > { %569 = vmatpush.bf16.msra.mxu2 %v834_v43 }
  0x52   : > { %392 = vmatpush.bf16.msra.mxu0 %v816_v11  ;;  %847 = vmatpush.bf16.msra.mxu3 %v816_v11 }
  0x53   : > { %482 = vmatpush.bf16.msra.mxu1 %v824_v21 }
  0x55   : > { %393 = vmatmul.bf16.vlgmr.msra.gmra.mxu0 %v317_v16  ;;  %398 = vmatmul.bf16.vlgmr.msra.gmra.mxu3 %v318_v17 }
  0x56   : > { %570 = vmatpush.bf16.msra.mxu2 %v833_v44 }
  0x5a   : > { %571 = vmatpush.bf16.msra.mxu2 %v832_v45 }
  0xd2   : > { %v394_v24 = vpop.f32.mrf.mxu0 }
  0xd3   : > { %v395_v28 = vadd.f32 %v394_v24, %v336_v26 }
  0xd5   : > { %v404_v33 = vmax.f32 %v395_v28, 0.0 }
  0xd8   : > { %v399_v30 = vpop.f32.mrf.mxu3 }
  0xd9   : > { %v400_v37 = vadd.f32 %v399_v30, %v336_v26 }
  0xda   : > { %v396_v29 = vpop.f32.mrf.mxu0 }
  0xdb   : > { %v397_v31 = vadd.f32 %v396_v29, %v336_v26  ;;  %v406_v39 = vmax.f32 %v400_v37, 0.0 }
  0xdd   : > { %v405_v34 = vmax.f32 %v397_v31, 0.0 }
  0xdf   : > { %v408_v35 = vpack.c.bf16 %v405_v34, %v404_v33 }
  0xe0   : > { %v401_v36 = vpop.f32.mrf.mxu3 }
  0xe1   : > { %483 = vmatmul.bf16.vlgmr.msra.gmra.mxu1 %v408_v35  ;;  %v402_v38 = vadd.f32 %v401_v36, %v336_v26 }
  0xe3   : > { %v407_v40 = vmax.f32 %v402_v38, 0.0 }
  0xe5   : > { %v409_v41 = vpack.c.bf16 %v407_v40, %v406_v39 }
  0xf1   : > { %488 = vmatmul.bf16.gmra.mxu1 %v409_v41 }
 0x15e   : > { %v484_v46 = vpop.f32.mrf.mxu1 }
 0x15f   : > { %v485_v48 = vadd.f32 %v484_v46, %v426_v47 }
 0x161   : > { %v494_v51 = vmax.f32 %v485_v48, 0.0 }
 0x166   : > { %v486_v49 = vpop.f32.mrf.mxu1 }
 0x167   : > { %v487_v50 = vadd.f32 %v486_v49, %v426_v47 }
 0x169   : > { %v495_v52 = vmax.f32 %v487_v50, 0.0 }
 0x16b   : > { %v498_v53 = vpack.c.bf16 %v495_v52, %v494_v51 }
 0x16d   : > { %572 = vmatmul.bf16.vlgmr.msra.gmra.mxu2 %v498_v53 }
 0x16e   : > { %v489_v54 = vpop.f32.mrf.mxu1 }
 0x16f   : > { %v490_v55 = vadd.f32 %v489_v54, %v426_v47 }
 0x171   : > { %v496_v58 = vmax.f32 %v490_v55, 0.0 }
 0x176   : > { %v491_v56 = vpop.f32.mrf.mxu1 }
 0x177   : > { %v492_v57 = vadd.f32 %v491_v56, %v426_v47 }
 0x179   : > { %v497_v59 = vmax.f32 %v492_v57, 0.0 }
 0x17b   : > { %v499_v60 = vpack.c.bf16 %v497_v59, %v496_v58 }
 0x17d   : > { %577 = vmatmul.bf16.gmra.mxu2 %v499_v60 }
 0x1f0   : > { %v573_v62 = vpop.f32.mrf.mxu2 }
 0x1f1   : > { %v584_v63 = vadd.f32 %v583_v61, %v573_v62 }
 0x1f3   : > { %589 = vst.msk [vmem:[%s311_s18] sm:$0xff] %vm588_vm0, %v584_v63 }
 0x1f8   : > { %v575_v0 = vpop.f32.mrf.mxu2 }
 0x1f9   : > { %v585_v1 = vadd.f32 %v583_v61, %v575_v0 }
 0x1fb   : > { %590 = vst.msk [vmem:[%s311_s18 + $0x8] sm:$0xff] %vm588_vm0, %v585_v1 }
 0x200   : > { %v578_v2 = vpop.f32.mrf.mxu2 }
 0x201   : > { %v586_v3 = vadd.f32 %v583_v61, %v578_v2 }
 0x203   : > { %591 = vst.msk [vmem:[%s311_s18 + $0x10] sm:$0xff] %vm588_vm0, %v586_v3 }
 0x208   : > { %v580_v4 = vpop.f32.mrf.mxu2 }
 0x209   : > { %v587_v5 = vadd.f32 %v583_v61, %v580_v4 }
 0x20b   : > { %592 = vst.msk [vmem:[%s311_s18 + $0x18] sm:$0xff] %vm588_vm0, %v587_v5 }
 0x20c PF: > { %p17_p4 = scmp.ge.s32.totalorder %s1231_s7, 4   ;;  %s1312_s18 = smov %s1116_s19 }
 0x20d   : > { %s1313_s19 = smov %s1120_s20  ;;  %s1314_s20 = smov %s1242_s13 }
 0x20e   : > { %s1315_s21 = smov %s1231_s7  ;;  %19 = sbr.rel (!%p17_p4) target bundleno = 5 (0x5), region = 96 }
 0x213   :  { %615 = vsyncpa [#allocation3], 1 }
 0x214   :  { %617 = vsyncpa [#allocation3 + $0x1], 1 }
 0x215   :  { %618 = vsyncpa [#allocation5], 1 }
 0x216   :  { %619 = vsyncpa [#allocation8], 1 }

</bundles_post_ra>
